<compile_context>
chip_gen: v7x
topology: tpu7x:2x2x1
jax: 0.10.0
libtpu: 0.0.40
codegen_flags: <defaults>
</compile_context>

<pallas_src>
import jax
import jax.numpy as jnp
from jax.experimental import pallas as pl
from jax.experimental.pallas import tpu as pltpu

EPS = 1e-8

# VMEM accounting: 2 inputs x 2 pipeline buffers (native dtype) + up to
# _F32_TEMP_ARRAYS live block-sized f32 intermediates inside the body.
_VMEM_LIMIT_BYTES = 48 * 1024 * 1024   # fits v7x's 64 MiB physical with headroom
_BLOCK_BUDGET_BYTES = 26 * 1024 * 1024
_F32_TEMP_ARRAYS = 4


def _pearson_corr_kernel(pred_ref, targ_ref, corr_ref):
    """One (TB, L) row-tile: per-row Pearson correlation along axis 1.

    Single pass accumulating the five raw row moments; no centered copies are
    materialized (less VALU work and fewer f32 VMEM temporaries than two-pass).
    """
    p_raw = pred_ref[...]
    t_raw = targ_ref[...]
    pf = p_raw.astype(jnp.float32)
    tf = t_raw.astype(jnp.float32)
    L = pf.shape[1]
    inv_l = jnp.float32(1.0 / L)

    # First moments. For bf16 inputs push the native-dtype operands through the
    # otherwise-idle MXU as a ones-matvec (f32 accumulation), taking two of the
    # five row reductions off the VALU slot. f32 inputs are HBM-bound with large
    # VALU headroom, so keep them on the VPU (also avoids any f32-matmul
    # precision question).
    if (pred_ref.dtype == jnp.bfloat16 and targ_ref.dtype == jnp.bfloat16
            and L % 128 == 0):
        ones = jnp.ones((L, 1), dtype=jnp.bfloat16)
        sp = jnp.dot(p_raw, ones, preferred_element_type=jnp.float32)
        st = jnp.dot(t_raw, ones, preferred_element_type=jnp.float32)
    else:
        sp = jnp.sum(pf, axis=1, keepdims=True)
        st = jnp.sum(tf, axis=1, keepdims=True)

    # Second moments stay on the VPU (f32 products are exact for bf16 inputs).
    spp = jnp.sum(pf * pf, axis=1, keepdims=True)
    stt = jnp.sum(tf * tf, axis=1, keepdims=True)
    spt = jnp.sum(pf * tf, axis=1, keepdims=True)

    # corr = cov / max(sqrt(var_p * var_t), eps)  -- torch.nn.CosineSimilarity eps
    # semantics applied to row-centered data.
    # NOTE: the raw-moment form only loses precision when |row mean| >> row std;
    # for such data switch back to a two-pass / pivoted variant.
    cov = spt - sp * st * inv_l
    var_p = jnp.maximum(spp - sp * sp * inv_l, 0.0)
    var_t = jnp.maximum(stt - st * st * inv_l, 0.0)
    denom = jnp.maximum(jnp.sqrt(var_p * var_t), EPS)
    # Divide via reciprocal (EUP path); only TB values per step, exact mode.
    corr_ref[...] = cov * pl.reciprocal(denom, approx=False)


def _choose_row_tile(B, L, itemsize):
    """Row tile sized so (input buffers + f32 temporaries) fit the VMEM budget,
    rounded to the dtype's native sublane packing, and capped so the grid has
    >=2 steps whenever possible (megacore sharding on v7x)."""
    sub = {4: 8, 2: 16, 1: 32}.get(itemsize, 8)     # native sublane multiple
    bytes_per_row = L * (4 * itemsize + 4 * _F32_TEMP_ARRAYS)
    tb = _BLOCK_BUDGET_BYTES // max(1, bytes_per_row)
    tb = max(sub, (tb // sub) * sub)
    # TODO(synk): for extremely large L (a single `sub`-row tile overflows the
    # budget, L > ~100k), switch to an L-chunked moment-accumulation variant.
    if B > sub:
        # Keep >=2 grid steps so dimension_semantics=("parallel",) can use both
        # TensorCores on v7x; the extra step is ~free on single-core chips.
        half = -(-B // 2)
        half = -(-half // sub) * sub
        tb = min(tb, half)
    if tb >= B:
        return B                                     # full-dim block is always legal
    return tb


def pearson_correlation(predictions, targets, *, row_tile=None):
    """Per-row Pearson correlation along axis 1. predictions/targets: [B, L].

    Inputs are streamed in their native dtype (keep bf16 activations as bf16);
    all arithmetic happens in f32 inside the kernel.
    """
    assert predictions.shape == targets.shape and predictions.ndim == 2
    B, L = predictions.shape
    itemsize = max(jnp.dtype(predictions.dtype).itemsize,
                   jnp.dtype(targets.dtype).itemsize)
    tb = _choose_row_tile(B, L, itemsize) if row_tile is None else min(row_tile, B)

    corr = pl.pallas_call(
        _pearson_corr_kernel,
        out_shape=jax.ShapeDtypeStruct((B, 1), jnp.float32),
        grid=(pl.cdiv(B, tb),),
        in_specs=[
            pl.BlockSpec((tb, L), lambda i: (i, 0)),
            pl.BlockSpec((tb, L), lambda i: (i, 0)),
        ],
        # (tb, 1) output blocks are masked stores, but at tb floats/step the
        # writeback is negligible next to the multi-MiB input DMA; a lane-dense
        # (1, tb) layout would need a sublane->lane relayout for no measurable win.
        out_specs=pl.BlockSpec((tb, 1), lambda i: (i, 0)),
        compiler_params=pltpu.CompilerParams(
            dimension_semantics=("parallel",),
            vmem_limit_bytes=_VMEM_LIMIT_BYTES,
        ),
    )(predictions, targets)
    return corr[:, 0]


def pearson_correlation_loss(predictions, targets, reduction="sum", *, row_tile=None):
    """Negative Pearson-correlation loss matching the PyTorch module semantics."""
    corr = pearson_correlation(predictions, targets, row_tile=row_tile)
    if reduction == "sum":
        return 1.0 - jnp.sum(corr)
    elif reduction == "mean":
        return 1.0 - jnp.mean(corr)
    elif reduction == "none" or reduction is None:
        return 1.0 - corr
    else:
        raise ValueError(f"Invalid reduction: {reduction}")


def _pearson_loss_ref(predictions, targets, reduction="sum"):
    p = predictions.astype(jnp.float32)
    t = targets.astype(jnp.float32)
    pc = p - jnp.mean(p, axis=1, keepdims=True)
    tc = t - jnp.mean(t, axis=1, keepdims=True)
    w12 = jnp.sum(pc * tc, axis=1)
    denom = jnp.maximum(
        jnp.sqrt(jnp.sum(pc * pc, axis=1) * jnp.sum(tc * tc, axis=1)), EPS)
    corr = w12 / denom
    if reduction == "sum":
        return 1.0 - jnp.sum(corr)
    if reduction == "mean":
        return 1.0 - jnp.mean(corr)
    return 1.0 - corr


if __name__ == "__main__":
    key = jax.random.PRNGKey(0)

    def make_inputs(k, B, L, dtype=jnp.float32):
        kp, kt = jax.random.split(k)
        p = jax.random.normal(kp, (B, L), dtype=jnp.float32)
        # Correlate targets with predictions plus noise so corr is non-trivial.
        t = 0.7 * p + 0.3 * jax.random.normal(kt, (B, L), dtype=jnp.float32)
        return p.astype(dtype), t.astype(dtype)

    k1, k2, k3 = jax.random.split(key, 3)

    # 1) Small single-tile case (TB == B), f32, VPU reduction path, reduction='sum'.
    p, t = make_inputs(k1, 8, 256)
    loss = jax.block_until_ready(pearson_correlation_loss(p, t, "sum"))
    ref = _pearson_loss_ref(p, t, "sum")
    assert jnp.allclose(loss, ref, atol=1e-4, rtol=1e-4), (loss, ref)

    # 2) Multi-tile grid with a ragged last tile: forced row_tile=8 and auto tiling.
    p, t = make_inputs(k2, 20, 512)
    for red in ("sum", "mean", "none"):
        out = jax.block_until_ready(
            pearson_correlation_loss(p, t, red, row_tile=8))
        ref = _pearson_loss_ref(p, t, red)
        assert jnp.allclose(out, ref, atol=1e-4, rtol=1e-4), (red, out, ref)
    out = jax.block_until_ready(pearson_correlation_loss(p, t, "sum"))
    ref = _pearson_loss_ref(p, t, "sum")
    assert jnp.allclose(out, ref, atol=1e-4, rtol=1e-4), (out, ref)

    # 3) bf16 path: stream bf16 from HBM, MXU ones-matvec for the first moments,
    #    bf16-native 16-row tile, ragged multi-tile grid.
    p, t = make_inputs(k3, 24, 384, dtype=jnp.bfloat16)
    out = jax.block_until_ready(
        pearson_correlation_loss(p, t, "sum", row_tile=16))
    ref = _pearson_loss_ref(p, t, "sum")
    assert jnp.allclose(out, ref, atol=1e-3, rtol=1e-3), (out, ref)

    print("KERNEL_OK")
</pallas_src>

<mosaic_0001>
module attributes {stable_mosaic.version = 11 : i64} {
  func.func @_pearson_corr_kernel(%arg0: i32, %arg1: memref<8x256xf32, #tpu.memory_space<vmem>>, %arg2: memref<8x256xf32, #tpu.memory_space<vmem>>, %arg3: memref<8x1xf32, #tpu.memory_space<vmem>>) attributes {dimension_semantics = [#tpu.dimension_semantics<parallel>], iteration_bounds = array<i64: 1>, scalar_prefetch = 0 : i64, scratch_operands = 0 : i64, tpu.core_type = #tpu.core_type<tc>, window_params = [{transform_indices = @transform_0, window_bounds = array<i64: 8, 256>}, {transform_indices = @transform_1, window_bounds = array<i64: 8, 256>}, {transform_indices = @transform_2, window_bounds = array<i64: 8, 1>}]} {
    %c0 = arith.constant 0 : index
    %c0_0 = arith.constant 0 : index
    %0 = vector.load %arg1[%c0, %c0_0] : memref<8x256xf32, #tpu.memory_space<vmem>>, vector<8x256xf32>
    %c0_1 = arith.constant 0 : index
    %c0_2 = arith.constant 0 : index
    %1 = vector.load %arg2[%c0_1, %c0_2] : memref<8x256xf32, #tpu.memory_space<vmem>>, vector<8x256xf32>
    %cst = arith.constant dense<0.000000e+00> : vector<8xf32>
    %2 = vector.multi_reduction <add>, %0, %cst [1] : vector<8x256xf32> to vector<8xf32>
    %3 = vector.shape_cast %2 : vector<8xf32> to vector<8x1xf32>
    %cst_3 = arith.constant dense<0.000000e+00> : vector<8xf32>
    %4 = vector.multi_reduction <add>, %1, %cst_3 [1] : vector<8x256xf32> to vector<8xf32>
    %5 = vector.shape_cast %4 : vector<8xf32> to vector<8x1xf32>
    %6 = arith.mulf %0, %0 : vector<8x256xf32>
    %cst_4 = arith.constant dense<0.000000e+00> : vector<8xf32>
    %7 = vector.multi_reduction <add>, %6, %cst_4 [1] : vector<8x256xf32> to vector<8xf32>
    %8 = vector.shape_cast %7 : vector<8xf32> to vector<8x1xf32>
    %9 = arith.mulf %1, %1 : vector<8x256xf32>
    %cst_5 = arith.constant dense<0.000000e+00> : vector<8xf32>
    %10 = vector.multi_reduction <add>, %9, %cst_5 [1] : vector<8x256xf32> to vector<8xf32>
    %11 = vector.shape_cast %10 : vector<8xf32> to vector<8x1xf32>
    %12 = arith.mulf %0, %1 : vector<8x256xf32>
    %cst_6 = arith.constant dense<0.000000e+00> : vector<8xf32>
    %13 = vector.multi_reduction <add>, %12, %cst_6 [1] : vector<8x256xf32> to vector<8xf32>
    %14 = vector.shape_cast %13 : vector<8xf32> to vector<8x1xf32>
    %15 = arith.mulf %3, %5 : vector<8x1xf32>
    %cst_7 = arith.constant 3.906250e-03 : f32
    %16 = vector.broadcast %cst_7 : f32 to vector<8x1xf32>
    %17 = arith.mulf %15, %16 : vector<8x1xf32>
    %18 = arith.subf %14, %17 : vector<8x1xf32>
    %19 = arith.mulf %3, %3 : vector<8x1xf32>
    %cst_8 = arith.constant 3.906250e-03 : f32
    %20 = vector.broadcast %cst_8 : f32 to vector<8x1xf32>
    %21 = arith.mulf %19, %20 : vector<8x1xf32>
    %22 = arith.subf %8, %21 : vector<8x1xf32>
    %cst_9 = arith.constant 0.000000e+00 : f32
    %23 = vector.broadcast %cst_9 : f32 to vector<8x1xf32>
    %24 = arith.maximumf %22, %23 : vector<8x1xf32>
    %25 = arith.mulf %5, %5 : vector<8x1xf32>
    %cst_10 = arith.constant 3.906250e-03 : f32
    %26 = vector.broadcast %cst_10 : f32 to vector<8x1xf32>
    %27 = arith.mulf %25, %26 : vector<8x1xf32>
    %28 = arith.subf %11, %27 : vector<8x1xf32>
    %cst_11 = arith.constant 0.000000e+00 : f32
    %29 = vector.broadcast %cst_11 : f32 to vector<8x1xf32>
    %30 = arith.maximumf %28, %29 : vector<8x1xf32>
    %31 = arith.mulf %24, %30 : vector<8x1xf32>
    %32 = math.sqrt %31 : vector<8x1xf32>
    %cst_12 = arith.constant 9.99999993E-9 : f32
    %33 = vector.broadcast %cst_12 : f32 to vector<8x1xf32>
    %34 = arith.maximumf %32, %33 : vector<8x1xf32>
    %35 = tpu.reciprocal %34 : vector<8x1xf32> -> vector<8x1xf32>
    %36 = arith.mulf %18, %35 : vector<8x1xf32>
    %c0_13 = arith.constant 0 : index
    %c0_14 = arith.constant 0 : index
    %37 = vector.load %arg3[%c0_13, %c0_14] : memref<8x1xf32, #tpu.memory_space<vmem>>, vector<8x1xf32>
    tpu.vector_store %arg3[%c0_13, %c0_14], %36 {strides = array<i32>} : memref<8x1xf32, #tpu.memory_space<vmem>>, vector<8x1xf32>,
    return
  }
  func.func @transform_0(%arg0: i32) -> (i32, i32) {
    %c0_i32 = arith.constant 0 : i32
    %c0_i32_0 = arith.constant 0 : i32
    return %arg0, %c0_i32 : i32, i32
  }
  func.func @transform_1(%arg0: i32) -> (i32, i32) {
    %c0_i32 = arith.constant 0 : i32
    %c0_i32_0 = arith.constant 0 : i32
    return %arg0, %c0_i32 : i32, i32
  }
  func.func @transform_2(%arg0: i32) -> (i32, i32) {
    %c0_i32 = arith.constant 0 : i32
    %c0_i32_0 = arith.constant 0 : i32
    return %arg0, %c0_i32 : i32, i32
  }
}

</mosaic_0001>

<bundles_post_ra>
// kernel: tpu_custom_call.1
= control target key start
LH: loop header
LB: loop body
LE: loop exit
PB: predicated region body
PF: predicated region fallthrough
CT: control target
= control target key end

     0   :  { %7 = vsyncpa [#allocation3], 0  ;;  %s188_s0 = inlined_call_operand.hbm [shape: f32[8,256], index: 0, kind: input, shape index: {}]   ;;  %s189_s1 = inlined_call_operand.hbm [shape: f32[8,256], index: 1, kind: input, shape index: {}]   ;;  %s190_s2 = inlined_call_operand.vmem [shape: f32[8,1], index: 2, kind: output, shape index: {}]  }
   0x1   :  { %8 = vsyncpa [#allocation5], 0  ;;  %s144_s9 = smov [#allocation2]   ;;  %s145_s11 = smov [#allocation4]  }
   0x2   :  { %s15_s10 = sshll.u32 %s144_s9, 4  ;;  %s25_s12 = sshll.u32 %s145_s11, 4  ;;  %s16_s10 = int_to_ptr.vmem [resolvable:$true] %s15_s10  ;;  %s26_s12 = int_to_ptr.vmem [resolvable:$true] %s25_s12 }
   0x3   :  { %s96_s15 = scalar_lea.hbm %s188_s0, 256 }
   0x4   :  { %p97_p0 = scmp.ne.s32.totalorder %s188_s0, %s96_s15  ;;  %p100_p1 = scmp.lt.u32.totalorder %s96_s15, %s188_s0 }
   0x6   :  { %p102_p2 = pnand %p100_p1, %p97_p0 }
   0x8   :  { %105 = shalt.err (!%p102_p2)
}
   0x9   :  { %s106_s20 = scalar_lea.vmem %s16_s10, 256  ;;  %p111_p4 = scmp.lt.s32.totalorder %s16_s10, %s16_s10 }
   0xa   :  { %p107_p3 = scmp.ne.s32.totalorder %s16_s10, %s106_s20  ;;  %p112_p5 = scmp.lt.s32.totalorder %s106_s20, %s106_s20 }
   0xc   :  { %p113_p6 = por %p112_p5, %p111_p4 }
   0xe   :  { %p114_p7 = pnand %p113_p6, %p107_p3 }
  0x10   :  { %117 = shalt.err (!%p114_p7)
}
  0x11   :  { %18 = dma.hbm_to_vmem [thread:$0]  %s188_s0, 256, %s16_s10, [#allocation3]  }
  0x12   :  { %s118_s25 = scalar_lea.hbm %s189_s1, 256 }
  0x13   :  { %p119_p8 = scmp.ne.s32.totalorder %s189_s1, %s118_s25  ;;  %p122_p9 = scmp.lt.u32.totalorder %s118_s25, %s189_s1 }
  0x15   :  { %p124_p10 = pnand %p122_p9, %p119_p8 }
  0x17   :  { %127 = shalt.err (!%p124_p10)
}
  0x18   :  { %s128_s30 = scalar_lea.vmem %s26_s12, 256  ;;  %p133_p12 = scmp.lt.s32.totalorder %s26_s12, %s26_s12 }
  0x19   :  { %p129_p11 = scmp.ne.s32.totalorder %s26_s12, %s128_s30  ;;  %p134_p13 = scmp.lt.s32.totalorder %s128_s30, %s128_s30 }
  0x1b   :  { %p135_p0 = por %p134_p13, %p133_p12 }
  0x1d   :  { %p136_p1 = pnand %p135_p0, %p129_p11 }
  0x1f   :  { %139 = shalt.err (!%p136_p1)
}
  0x20   :  { %28 = dma.hbm_to_vmem [thread:$0]  %s189_s1, 256, %s26_s12, [#allocation5]  }
  0x21   :  { %140 = dma.done.wait [#allocation3], 256  }
  0x22   :  { %141 = vsyncadd [#allocation3], 4294967040 }
  0x23   :  { %142 = dma.done.wait [#allocation5], 256  }
  0x24   :  { %143 = vsyncadd [#allocation5], 4294967040  ;;  %v35_v0 = vld [vmem:[#allocation2] sm:$0xff]  ;;  %v36_v1 = vld [vmem:[#allocation2 + $0x8] sm:$0xff]  ;;  %vm82_vm2 = vcmask 7168  }
  0x25   :  { %v37_v2 = vld [vmem:[#allocation4] sm:$0xff]  ;;  %v39_v3 = vadd.f32 %v36_v1, %v35_v0  ;;  %v45_v4 = vmul.f32 %v35_v0, %v35_v0  ;;  %v46_v5 = vmul.f32 %v36_v1, %v36_v1  ;;  %v38_v6 = vld [vmem:[#allocation4 + $0x8] sm:$0xff] }
  0x26   :  { %v50_v7 = vmul.f32 %v37_v2, %v37_v2  ;;  %v51_v8 = vmul.f32 %v38_v6, %v38_v6  ;;  %v42_v10 = vadd.f32 %v38_v6, %v37_v2  ;;  %v55_v11 = vmul.f32 %v37_v2, %v35_v0 }
  0x27   :  { %40 = vadd.xlane.f32.xlu0 %v39_v3  ;;  %v47_v9 = vadd.f32 %v46_v5, %v45_v4  ;;  %v56_v12 = vmul.f32 %v38_v6, %v36_v1 }
  0x28   :  { %v52_v13 = vadd.f32 %v51_v8, %v50_v7 }
  0x29   :  { %48 = vadd.xlane.f32.xlu1 %v47_v9  ;;  %v57_v14 = vadd.f32 %v56_v12, %v55_v11 }
  0x2b   :  { %43 = vadd.xlane.f32.xlu0 %v42_v10 }
  0x2d   :  { %53 = vadd.xlane.f32.xlu1 %v52_v13 }
  0x2f   :  { %58 = vadd.xlane.f32.xlu0 %v57_v14 }
  0xb4   :  { %v41_v15 = vpop.xlane.xlu0 %40 }
  0xb5   :  { %v63_v16 = vmul.f32 %v41_v15, %v41_v15 }
  0xb6   :  { %v49_v17 = vpop.xlane.xlu1 %48 }
  0xb7   :  { %v64_v18 = vmul.f32 0.00390625, %v63_v16 }
  0xb8   :  { %v44_v19 = vpop.xlane.xlu0 %43 }
  0xb9   :  { %v67_v20 = vmul.f32 %v44_v19, %v44_v19  ;;  %v65_v22 = vsub.f32 %v49_v17, %v64_v18  ;;  %v60_v34 = vmul.f32 %v44_v19, %v41_v15 }
  0xba   :  { %v54_v21 = vpop.xlane.xlu1 %53 }
  0xbb   :  { %v68_v23 = vmul.f32 0.00390625, %v67_v20  ;;  %v66_v25 = vmax.f32 %v65_v22, 0.0  ;;  %v61_v35 = vmul.f32 0.00390625, %v60_v34 }
  0xbc   :  { %v59_v36 = vpop.xlane.xlu0 %58 }
  0xbd   :  { %v69_v24 = vsub.f32 %v54_v21, %v68_v23  ;;  %v62_v37 = vsub.f32 %v59_v36, %v61_v35 }
  0xbf   :  { %v70_v26 = vmax.f32 %v69_v24, 0.0 }
  0xc1   :  { %v71_v27 = vmul.f32 %v70_v26, %v66_v25 }
  0xc3   :  { %92 = vrsqrt.f32 %v71_v27  ;;  %vm74_vm0 = vcmp.eq.f32.partialorder %v71_v27, inf  ;;  %v77_v30 = vand.u32 2147483648, %v71_v27  ;;  %vm76_vm1 = vcmp.eq.f32.partialorder %v71_v27, 0.0 }
  0xcd   :  { %v93_v28 = vpop.eup %92 }
  0xce   :  { %v73_v29 = vmul.f32 %v93_v28, %v71_v27 }
  0xd0   :  { %v75_v31 = vsel %vm74_vm0, %v71_v27, %v73_v29 }
  0xd1   :  { %v78_v32 = vsel %vm76_vm1, %v77_v30, %v75_v31 }
  0xd2   :  { %v79_v33 = vmax.f32 %v78_v32, 1e-08 }
  0xd4   :  { %94 = vrcp.f32 %v79_v33 }
  0xde   :  { %v95_v38 = vpop.eup %94 }
  0xdf   :  { %v81_v39 = vmul.f32 %v95_v38, %v62_v37 }
  0xe1   :  { %83 = vst.msk [vmem:[%s190_s2] sm:$0xff] %vm82_vm2, %v81_v39 }
  0xe2   :  { %88 = vsyncpa [#allocation3], 1 }
  0xe3   :  { %89 = vsyncpa [#allocation5], 1 }

</bundles_post_ra>
